<compile_context>
chip_gen: v7x
topology: tpu7x:2x2x1
jax: 0.10.0
libtpu: 0.0.40
codegen_flags: <defaults>
</compile_context>

<pallas_src>
import functools

import jax
import jax.numpy as jnp
from jax.experimental import pallas as pl
from jax.experimental.pallas import tpu as pltpu


def _nt_xent_kernel(zq_ref, zc_ref, o_ref, m_sc, l_sc, p_sc, *,
                    n, tq, tc, temperature, margin, norm_eps, mxu_dtype):
    i = pl.program_id(0)
    j = pl.program_id(1)
    n2 = 2 * n

    @pl.when(j == 0)
    def _():
        m_sc[...] = jnp.full_like(m_sc, -jnp.inf)
        l_sc[...] = jnp.zeros_like(l_sc)
        p_sc[...] = jnp.zeros_like(p_sc)

    # Row-normalize the two tiles once (O(T*D) VPU work) instead of dividing
    # the (tq, tc) similarity tile by a norm outer product.
    # TODO(synk): eps clamp is applied per-row-norm (|z| >= sqrt(eps)) rather
    #             than on the norm product; identical for non-degenerate rows.
    zq = zq_ref[...].astype(jnp.float32)
    zc = zc_ref[...].astype(jnp.float32)
    qn = jnp.maximum(jnp.sqrt(jnp.sum(zq * zq, axis=-1, keepdims=True)), norm_eps)
    cn = jnp.maximum(jnp.sqrt(jnp.sum(zc * zc, axis=-1, keepdims=True)), norm_eps)
    zq_n = (zq / qn).astype(mxu_dtype)
    zc_n = (zc / cn).astype(mxu_dtype)

    # Cosine-similarity tile on the MXU; contract last dims of both operands
    # (no explicit transpose), accumulate in f32.
    sim = jax.lax.dot_general(
        zq_n, zc_n, (((1,), (1,)), ((), ())),
        preferred_element_type=jnp.float32)                       # (tq, tc)

    # Global row / col indices of this tile (masks regenerated in-kernel,
    # no (2N,2N) margin / label matrices streamed from HBM).
    row = i * tq + jax.lax.broadcasted_iota(jnp.int32, (tq, tc), 0)
    col = j * tc + jax.lax.broadcasted_iota(jnp.int32, (tq, tc), 1)
    pos = col == ((row + n) % n2)          # positive-pair column per row
    diag = row == col                      # self-similarity

    inv_t = jnp.float32(1.0 / temperature)
    logits = (sim - jnp.where(pos, jnp.float32(margin), jnp.float32(0.0))) * inv_t

    # Positive-pair (label) logit: exactly one column over the whole row, so
    # accumulating the per-tile masked sum yields the picked logit.
    p_sc[...] += jnp.sum(jnp.where(pos, logits, 0.0), axis=-1, keepdims=True)

    # Diagonal mask folded into the logits with a single select.
    logits = jnp.where(diag, jnp.float32(-1e9), logits)

    # Online softmax (running max / sum-of-exp).
    m_prev = m_sc[...]
    m_new = jnp.maximum(m_prev, jnp.max(logits, axis=-1, keepdims=True))
    l_sc[...] = l_sc[...] * jnp.exp(m_prev - m_new) + jnp.sum(
        jnp.exp(logits - m_new), axis=-1, keepdims=True)
    m_sc[...] = m_new

    @pl.when(j == pl.num_programs(1) - 1)
    def _():
        lse = m_sc[...] + jnp.log(l_sc[...])
        o_ref[...] = lse - p_sc[...]       # per-row cross-entropy


def _pick_tile(n, candidates):
    for t in candidates:
        if n % t == 0:
            return t
    return n  # small / odd sizes: take the full extent (full-dim block is legal)


def nt_xent_loss(z_i, z_j, *, temperature, margin, world_size=1,
                 mxu_dtype=jnp.bfloat16):
    assert world_size == 1, "GatherLayer (multi-device) not implemented"
    z = jnp.concatenate([z_i, z_j], axis=0)                    # (2N, D)
    n2, d = z.shape
    n = n2 // 2

    # MXU-friendly, lane-dense tiles; sized to fit v7x's 64 MiB VMEM with
    # double-buffering headroom.
    tq = _pick_tile(n2, (256, 128))
    tc = _pick_tile(n2, (512, 256, 128))
    grid = (n2 // tq, n2 // tc)

    kernel = functools.partial(
        _nt_xent_kernel, n=n, tq=tq, tc=tc,
        temperature=float(temperature), margin=float(margin),
        norm_eps=1e-6 ** 0.5, mxu_dtype=mxu_dtype)

    per_row = pl.pallas_call(
        kernel,
        out_shape=jax.ShapeDtypeStruct((n2, 1), jnp.float32),
        grid_spec=pltpu.PrefetchScalarGridSpec(
            num_scalar_prefetch=0,
            grid=grid,
            in_specs=[
                pl.BlockSpec((tq, d), lambda i, j: (i, 0)),    # row tile of z
                pl.BlockSpec((tc, d), lambda i, j: (j, 0)),    # col tile of z
            ],
            out_specs=pl.BlockSpec((tq, 1), lambda i, j: (i, 0)),
            scratch_shapes=[
                pltpu.VMEM((tq, 1), jnp.float32),   # running max
                pltpu.VMEM((tq, 1), jnp.float32),   # running sum of exp
                pltpu.VMEM((tq, 1), jnp.float32),   # picked (label) logit
            ]),
        compiler_params=pltpu.CompilerParams(
            dimension_semantics=("parallel", "arbitrary"),
            # deliberate scoped-VMEM budget: below v7x's 64 MiB physical VMEM
            vmem_limit_bytes=48 * 1024 * 1024),
        cost_estimate=pl.CostEstimate(
            flops=2 * n2 * n2 * d,
            transcendentals=n2 * n2 + n2,
            bytes_accessed=2 * n2 * d * 4 + n2 * 4),
    )(z, z)
    # Tiny O(2N) mean kept outside so the parallel row axis stays race-free.
    return jnp.mean(per_row)


def nt_xent_loss_ref(z_i, z_j, *, temperature, margin):
    """Pure-JAX reference mirroring the PyTorch module."""
    batch_size = z_i.shape[0]
    z = jnp.concatenate([z_i, z_j], axis=0)
    n2 = z.shape[0]
    half = n2 // 2
    norms = jnp.sqrt(jnp.sum(z * z, axis=-1, keepdims=True))
    dots = jnp.dot(z, z.T, precision=jax.lax.Precision.HIGHEST)
    sim = dots / jnp.maximum(norms * norms.T, 1e-6)
    idx = jnp.arange(batch_size)
    pos = jnp.zeros((n2, n2), dtype=jnp.bool_)
    pos = pos.at[idx, idx + half].set(True)
    pos = pos.at[idx + half, idx].set(True)
    sim = (sim - pos.astype(jnp.float32) * margin) / temperature
    sim = sim - jnp.eye(n2) * 1.0e9
    labels = (jnp.arange(n2) + half) % n2
    logp = sim - jax.scipy.special.logsumexp(sim, axis=-1, keepdims=True)
    return -jnp.mean(logp[jnp.arange(n2), labels])


if __name__ == "__main__":
    batch_size = 8
    feature_dim = 128
    temperature = 0.5
    margin = 0.1
    world_size = 1

    key = jax.random.PRNGKey(0)
    k1, k2 = jax.random.split(key)
    z_i = jax.random.normal(k1, (batch_size, feature_dim), dtype=jnp.float32)
    z_j = jax.random.normal(k2, (batch_size, feature_dim), dtype=jnp.float32)

    ref = nt_xent_loss_ref(z_i, z_j, temperature=temperature, margin=margin)

    # f32 MXU path: tight correctness check.
    loss_f32 = nt_xent_loss(z_i, z_j, temperature=temperature, margin=margin,
                            world_size=world_size, mxu_dtype=jnp.float32)
    loss_f32 = jax.block_until_ready(loss_f32)
    assert jnp.allclose(loss_f32, ref, rtol=1e-4, atol=1e-4), (loss_f32, ref)

    # Default bf16 MXU feed (v6e/v7x fast path): looser tolerance.
    loss_bf16 = nt_xent_loss(z_i, z_j, temperature=temperature, margin=margin,
                             world_size=world_size, mxu_dtype=jnp.bfloat16)
    loss_bf16 = jax.block_until_ready(loss_bf16)
    assert jnp.allclose(loss_bf16, ref, rtol=2e-2, atol=2e-2), (loss_bf16, ref)

    print("KERNEL_OK")
</pallas_src>

<mosaic_0001>
module attributes {stable_mosaic.version = 11 : i64} {
  func.func @_nt_xent_kernel(%arg0: i32, %arg1: i32, %arg2: memref<16x128xf32, #tpu.memory_space<vmem>>, %arg3: memref<16x128xf32, #tpu.memory_space<vmem>>, %arg4: memref<16x1xf32, #tpu.memory_space<vmem>>, %arg5: memref<16x1xf32, #tpu.memory_space<vmem>>, %arg6: memref<16x1xf32, #tpu.memory_space<vmem>>, %arg7: memref<16x1xf32, #tpu.memory_space<vmem>>) attributes {dimension_semantics = [#tpu.dimension_semantics<parallel>, #tpu.dimension_semantics<arbitrary>], iteration_bounds = array<i64: 1, 1>, scalar_prefetch = 0 : i64, scratch_operands = 3 : i64, tpu.core_type = #tpu.core_type<tc>, window_params = [{transform_indices = @transform_0, window_bounds = array<i64: 16, 128>}, {transform_indices = @transform_1, window_bounds = array<i64: 16, 128>}, {transform_indices = @transform_2, window_bounds = array<i64: 16, 1>}]} {
    %c0_i32 = arith.constant 0 : i32
    %0 = arith.cmpi eq, %arg1, %c0_i32 : i32
    %1 = arith.extui %0 : i1 to i32
    %c0_i32_0 = arith.constant 0 : i32
    %2 = arith.cmpi ne, %1, %c0_i32_0 : i32
    scf.if %2 {
      %cst_36 = arith.constant 0xFF800000 : f32
      %84 = vector.broadcast %cst_36 : f32 to vector<16x1xf32>
      %c0_37 = arith.constant 0 : index
      %c0_38 = arith.constant 0 : index
      %85 = vector.load %arg5[%c0_37, %c0_38] : memref<16x1xf32, #tpu.memory_space<vmem>>, vector<16x1xf32>
      tpu.vector_store %arg5[%c0_37, %c0_38], %84 {strides = array<i32>} : memref<16x1xf32, #tpu.memory_space<vmem>>, vector<16x1xf32>,
      %cst_39 = arith.constant 0.000000e+00 : f32
      %86 = vector.broadcast %cst_39 : f32 to vector<16x1xf32>
      %c0_40 = arith.constant 0 : index
      %c0_41 = arith.constant 0 : index
      %87 = vector.load %arg6[%c0_40, %c0_41] : memref<16x1xf32, #tpu.memory_space<vmem>>, vector<16x1xf32>
      tpu.vector_store %arg6[%c0_40, %c0_41], %86 {strides = array<i32>} : memref<16x1xf32, #tpu.memory_space<vmem>>, vector<16x1xf32>,
      %cst_42 = arith.constant 0.000000e+00 : f32
      %88 = vector.broadcast %cst_42 : f32 to vector<16x1xf32>
      %c0_43 = arith.constant 0 : index
      %c0_44 = arith.constant 0 : index
      %89 = vector.load %arg7[%c0_43, %c0_44] : memref<16x1xf32, #tpu.memory_space<vmem>>, vector<16x1xf32>
      tpu.vector_store %arg7[%c0_43, %c0_44], %88 {strides = array<i32>} : memref<16x1xf32, #tpu.memory_space<vmem>>, vector<16x1xf32>,
    } else {
    }
    %c0 = arith.constant 0 : index
    %c0_1 = arith.constant 0 : index
    %3 = vector.load %arg2[%c0, %c0_1] : memref<16x128xf32, #tpu.memory_space<vmem>>, vector<16x128xf32>
    %c0_2 = arith.constant 0 : index
    %c0_3 = arith.constant 0 : index
    %4 = vector.load %arg3[%c0_2, %c0_3] : memref<16x128xf32, #tpu.memory_space<vmem>>, vector<16x128xf32>
    %5 = arith.mulf %3, %3 : vector<16x128xf32>
    %cst = arith.constant dense<0.000000e+00> : vector<16xf32>
    %6 = vector.multi_reduction <add>, %5, %cst [1] : vector<16x128xf32> to vector<16xf32>
    %7 = vector.shape_cast %6 : vector<16xf32> to vector<16x1xf32>
    %8 = math.sqrt %7 : vector<16x1xf32>
    %cst_4 = arith.constant 1.000000e-03 : f32
    %9 = vector.broadcast %cst_4 : f32 to vector<16x1xf32>
    %10 = arith.maximumf %8, %9 : vector<16x1xf32>
    %11 = arith.mulf %4, %4 : vector<16x128xf32>
    %cst_5 = arith.constant dense<0.000000e+00> : vector<16xf32>
    %12 = vector.multi_reduction <add>, %11, %cst_5 [1] : vector<16x128xf32> to vector<16xf32>
    %13 = vector.shape_cast %12 : vector<16xf32> to vector<16x1xf32>
    %14 = math.sqrt %13 : vector<16x1xf32>
    %cst_6 = arith.constant 1.000000e-03 : f32
    %15 = vector.broadcast %cst_6 : f32 to vector<16x1xf32>
    %16 = arith.maximumf %14, %15 : vector<16x1xf32>
    %17 = vector.broadcast %10 : vector<16x1xf32> to vector<16x128xf32>
    %18 = arith.divf %3, %17 : vector<16x128xf32>
    %19 = vector.broadcast %16 : vector<16x1xf32> to vector<16x128xf32>
    %20 = arith.divf %4, %19 : vector<16x128xf32>
    %cst_7 = arith.constant dense<0.000000e+00> : vector<16x16xf32>
    %21 = tpu.matmul %18, %20, %cst_7 {dimension_numbers = #tpu.dot_dimension_numbers<[1], [1], [0], [0], [0, 0, 1, 0], [], []>} : vector<16x128xf32>, vector<16x128xf32>, vector<16x16xf32> -> vector<16x16xf32>
    %c16_i32 = arith.constant 16 : i32
    %22 = arith.muli %arg0, %c16_i32 : i32
    %23 = tpu.iota {dimensions = array<i32: 0>} : vector<16x16xi32>
    %24 = vector.broadcast %22 : i32 to vector<16x16xi32>
    %25 = arith.addi %24, %23 : vector<16x16xi32>
    %c16_i32_8 = arith.constant 16 : i32
    %26 = arith.muli %arg1, %c16_i32_8 : i32
    %27 = tpu.iota {dimensions = array<i32: 1>} : vector<16x16xi32>
    %28 = vector.broadcast %26 : i32 to vector<16x16xi32>
    %29 = arith.addi %28, %27 : vector<16x16xi32>
    %c8_i32 = arith.constant 8 : i32
    %30 = vector.broadcast %c8_i32 : i32 to vector<16x16xi32>
    %31 = arith.addi %25, %30 : vector<16x16xi32>
    %c16_i32_9 = arith.constant 16 : i32
    %c0_i32_10 = arith.constant 0 : i32
    %32 = arith.cmpi eq, %c16_i32_9, %c0_i32_10 : i32
    %c1_i32 = arith.constant 1 : i32
    %33 = arith.select %32, %c1_i32, %c16_i32_9 : i32
    %34 = vector.broadcast %33 : i32 to vector<16x16xi32>
    %35 = arith.remsi %31, %34 : vector<16x16xi32>
    %c0_i32_11 = arith.constant 0 : i32
    %36 = vector.broadcast %c0_i32_11 : i32 to vector<16x16xi32>
    %37 = arith.cmpi ne, %35, %36 : vector<16x16xi32>
    %c0_i32_12 = arith.constant 0 : i32
    %38 = vector.broadcast %c0_i32_12 : i32 to vector<16x16xi32>
    %39 = arith.cmpi slt, %35, %38 : vector<16x16xi32>
    %c0_i32_13 = arith.constant 0 : i32
    %40 = arith.cmpi slt, %33, %c0_i32_13 : i32
    %41 = vector.broadcast %40 : i1 to vector<16x16xi1>
    %42 = vector.broadcast %41 : vector<16x16xi1> to vector<16x16xi1>
    %43 = arith.xori %39, %42 : vector<16x16xi1>
    %44 = arith.andi %43, %37 : vector<16x16xi1>
    %45 = vector.broadcast %33 : i32 to vector<16x16xi32>
    %46 = arith.addi %35, %45 : vector<16x16xi32>
    %47 = arith.select %44, %46, %35 : vector<16x16xi1>, vector<16x16xi32>
    %48 = arith.cmpi eq, %29, %47 : vector<16x16xi32>
    %49 = arith.cmpi eq, %25, %29 : vector<16x16xi32>
    %cst_14 = arith.constant 1.000000e-01 : f32
    %cst_15 = arith.constant 0.000000e+00 : f32
    %50 = vector.broadcast %cst_14 : f32 to vector<16x16xf32>
    %51 = vector.broadcast %cst_15 : f32 to vector<16x16xf32>
    %52 = arith.select %48, %50, %51 : vector<16x16xi1>, vector<16x16xf32>
    %53 = arith.subf %21, %52 : vector<16x16xf32>
    %cst_16 = arith.constant 2.000000e+00 : f32
    %54 = vector.broadcast %cst_16 : f32 to vector<16x16xf32>
    %55 = arith.mulf %53, %54 : vector<16x16xf32>
    %c0_17 = arith.constant 0 : index
    %c0_18 = arith.constant 0 : index
    %56 = vector.load %arg7[%c0_17, %c0_18] : memref<16x1xf32, #tpu.memory_space<vmem>>, vector<16x1xf32>
    %cst_19 = arith.constant 0.000000e+00 : f32
    %57 = vector.broadcast %cst_19 : f32 to vector<16x16xf32>
    %58 = arith.select %48, %55, %57 : vector<16x16xi1>, vector<16x16xf32>
    %cst_20 = arith.constant dense<0.000000e+00> : vector<16xf32>
    %59 = vector.multi_reduction <add>, %58, %cst_20 [1] : vector<16x16xf32> to vector<16xf32>
    %60 = vector.shape_cast %59 : vector<16xf32> to vector<16x1xf32>
    %61 = arith.addf %56, %60 : vector<16x1xf32>
    %c0_21 = arith.constant 0 : index
    %c0_22 = arith.constant 0 : index
    %62 = vector.load %arg7[%c0_21, %c0_22] : memref<16x1xf32, #tpu.memory_space<vmem>>, vector<16x1xf32>
    tpu.vector_store %arg7[%c0_21, %c0_22], %61 {strides = array<i32>} : memref<16x1xf32, #tpu.memory_space<vmem>>, vector<16x1xf32>,
    %cst_23 = arith.constant -1.000000e+09 : f32
    %63 = vector.broadcast %cst_23 : f32 to vector<16x16xf32>
    %64 = arith.select %49, %63, %55 : vector<16x16xi1>, vector<16x16xf32>
    %c0_24 = arith.constant 0 : index
    %c0_25 = arith.constant 0 : index
    %65 = vector.load %arg5[%c0_24, %c0_25] : memref<16x1xf32, #tpu.memory_space<vmem>>, vector<16x1xf32>
    %cst_26 = arith.constant dense<0xFF800000> : vector<16xf32>
    %66 = vector.multi_reduction <maximumf>, %64, %cst_26 [1] : vector<16x16xf32> to vector<16xf32>
    %67 = vector.shape_cast %66 : vector<16xf32> to vector<16x1xf32>
    %68 = arith.maximumf %65, %67 : vector<16x1xf32>
    %c0_27 = arith.constant 0 : index
    %c0_28 = arith.constant 0 : index
    %69 = vector.load %arg6[%c0_27, %c0_28] : memref<16x1xf32, #tpu.memory_space<vmem>>, vector<16x1xf32>
    %70 = arith.subf %65, %68 : vector<16x1xf32>
    %71 = math.exp %70 : vector<16x1xf32>
    %72 = arith.mulf %69, %71 : vector<16x1xf32>
    %73 = vector.broadcast %68 : vector<16x1xf32> to vector<16x16xf32>
    %74 = arith.subf %64, %73 : vector<16x16xf32>
    %75 = math.exp %74 : vector<16x16xf32>
    %cst_29 = arith.constant dense<0.000000e+00> : vector<16xf32>
    %76 = vector.multi_reduction <add>, %75, %cst_29 [1] : vector<16x16xf32> to vector<16xf32>
    %77 = vector.shape_cast %76 : vector<16xf32> to vector<16x1xf32>
    %78 = arith.addf %72, %77 : vector<16x1xf32>
    %c0_30 = arith.constant 0 : index
    %c0_31 = arith.constant 0 : index
    %79 = vector.load %arg6[%c0_30, %c0_31] : memref<16x1xf32, #tpu.memory_space<vmem>>, vector<16x1xf32>
    tpu.vector_store %arg6[%c0_30, %c0_31], %78 {strides = array<i32>} : memref<16x1xf32, #tpu.memory_space<vmem>>, vector<16x1xf32>,
    %c0_32 = arith.constant 0 : index
    %c0_33 = arith.constant 0 : index
    %80 = vector.load %arg5[%c0_32, %c0_33] : memref<16x1xf32, #tpu.memory_space<vmem>>, vector<16x1xf32>
    tpu.vector_store %arg5[%c0_32, %c0_33], %68 {strides = array<i32>} : memref<16x1xf32, #tpu.memory_space<vmem>>, vector<16x1xf32>,
    %c0_i32_34 = arith.constant 0 : i32
    %81 = arith.cmpi eq, %arg1, %c0_i32_34 : i32
    %82 = arith.extui %81 : i1 to i32
    %c0_i32_35 = arith.constant 0 : i32
    %83 = arith.cmpi ne, %82, %c0_i32_35 : i32
    scf.if %83 {
      %c0_36 = arith.constant 0 : index
      %c0_37 = arith.constant 0 : index
      %84 = vector.load %arg5[%c0_36, %c0_37] : memref<16x1xf32, #tpu.memory_space<vmem>>, vector<16x1xf32>
      %c0_38 = arith.constant 0 : index
      %c0_39 = arith.constant 0 : index
      %85 = vector.load %arg6[%c0_38, %c0_39] : memref<16x1xf32, #tpu.memory_space<vmem>>, vector<16x1xf32>
      %86 = math.log %85 : vector<16x1xf32>
      %87 = arith.addf %84, %86 : vector<16x1xf32>
      %c0_40 = arith.constant 0 : index
      %c0_41 = arith.constant 0 : index
      %88 = vector.load %arg7[%c0_40, %c0_41] : memref<16x1xf32, #tpu.memory_space<vmem>>, vector<16x1xf32>
      %89 = arith.subf %87, %88 : vector<16x1xf32>
      %c0_42 = arith.constant 0 : index
      %c0_43 = arith.constant 0 : index
      %90 = vector.load %arg4[%c0_42, %c0_43] : memref<16x1xf32, #tpu.memory_space<vmem>>, vector<16x1xf32>
      tpu.vector_store %arg4[%c0_42, %c0_43], %89 {strides = array<i32>} : memref<16x1xf32, #tpu.memory_space<vmem>>, vector<16x1xf32>,
    } else {
    }
    return
  }
  func.func @transform_0(%arg0: i32, %arg1: i32) -> (i32, i32) {
    %c0_i32 = arith.constant 0 : i32
    %c0_i32_0 = arith.constant 0 : i32
    return %arg0, %c0_i32 : i32, i32
  }
  func.func @transform_1(%arg0: i32, %arg1: i32) -> (i32, i32) {
    %c0_i32 = arith.constant 0 : i32
    %c0_i32_0 = arith.constant 0 : i32
    return %arg1, %c0_i32 : i32, i32
  }
  func.func @transform_2(%arg0: i32, %arg1: i32) -> (i32, i32) {
    %c0_i32 = arith.constant 0 : i32
    %c0_i32_0 = arith.constant 0 : i32
    return %arg0, %c0_i32 : i32, i32
  }
}

</mosaic_0001>

<bundles_post_ra>
// kernel: tpu_custom_call.1
= control target key start
LH: loop header
LB: loop body
LE: loop exit
PB: predicated region body
PF: predicated region fallthrough
CT: control target
= control target key end

     0   :  { %7 = vsyncpa [#allocation6], 0  ;;  %s508_s0 = inlined_call_operand.hbm [shape: f32[16,128], index: 0, kind: input, shape index: {}]   ;;  %s509_s1 = inlined_call_operand.hbm [shape: f32[16,128], index: 1, kind: input, shape index: {}]   ;;  %s510_s2 = inlined_call_operand.vmem [shape: f32[16,1], index: 2, kind: output, shape index: {}]  }
   0x1   :  { %8 = vsyncpa [#allocation8], 0  ;;  %s420_s9 = smov [#allocation5]   ;;  %s372_s13 = scalar_lea.hbm %s508_s0, 256 }
   0x2   :  { %s14_s10 = sshll.u32 %s420_s9, 4  ;;  %p373_p0 = scmp.ne.s32.totalorder %s508_s0, %s372_s13  ;;  %s15_s10 = int_to_ptr.vmem [resolvable:$true] %s14_s10 }
   0x3   :  { %p376_p1 = scmp.lt.u32.totalorder %s372_s13, %s508_s0 }
   0x5   :  { %p378_p2 = pnand %p376_p1, %p373_p0 }
   0x7   :  { %381 = shalt.err (!%p378_p2)
}
   0x8   :  { %s382_s18 = scalar_lea.vmem %s15_s10, 256  ;;  %p387_p4 = scmp.lt.s32.totalorder %s15_s10, %s15_s10 }
   0x9   :  { %p383_p3 = scmp.ne.s32.totalorder %s15_s10, %s382_s18  ;;  %p388_p5 = scmp.lt.s32.totalorder %s382_s18, %s382_s18 }
   0xb   :  { %p389_p6 = por %p388_p5, %p387_p4 }
   0xd   :  { %p390_p7 = pnand %p389_p6, %p383_p3 }
   0xf   :  { %393 = shalt.err (!%p390_p7)
}
  0x10   :  { %s421_s19 = smov 128   ;;  %s422_s20 = smov 8  }
  0x11   :  { %20 = dma.hbm_to_vmem [thread:$0]  %s508_s0, 256, %s15_s10, [#allocation6], %s421_s19, %s421_s19, %s422_s20  }
  0x12   :  { %s423_s23 = smov [#allocation7]   ;;  %s394_s27 = scalar_lea.hbm %s509_s1, 256 }
  0x13   :  { %s26_s24 = sshll.u32 %s423_s23, 4  ;;  %p395_p8 = scmp.ne.s32.totalorder %s509_s1, %s394_s27  ;;  %s27_s24 = int_to_ptr.vmem [resolvable:$true] %s26_s24 }
  0x14   :  { %p398_p9 = scmp.lt.u32.totalorder %s394_s27, %s509_s1 }
  0x16   :  { %p400_p10 = pnand %p398_p9, %p395_p8 }
  0x18   :  { %403 = shalt.err (!%p400_p10)
}
  0x19   :  { %s404_s4 = scalar_lea.vmem %s27_s24, 256  ;;  %p409_p12 = scmp.lt.s32.totalorder %s27_s24, %s27_s24 }
  0x1a   :  { %p405_p11 = scmp.ne.s32.totalorder %s27_s24, %s404_s4  ;;  %p410_p13 = scmp.lt.s32.totalorder %s404_s4, %s404_s4 }
  0x1c   :  { %p411_p0 = por %p410_p13, %p409_p12 }
  0x1e   :  { %p412_p1 = pnand %p411_p0, %p405_p11 }
  0x20   :  { %415 = shalt.err (!%p412_p1)
}
  0x21   :  { %32 = dma.hbm_to_vmem [thread:$0]  %s509_s1, 256, %s27_s24, [#allocation8], %s421_s19, %s421_s19, %s422_s20  }
  0x22   :  { %416 = dma.done.wait [#allocation6], 256  }
  0x23   :  { %417 = vsyncadd [#allocation6], 4294967040 }
  0x24   :  { %418 = dma.done.wait [#allocation8], 256  }
  0x25   :  { %419 = vsyncadd [#allocation8], 4294967040  ;;  %v52_v0 = vld [vmem:[#allocation7] sm:$0xff]  ;;  %v50_v1 = vld [vmem:[#allocation5] sm:$0xff]  ;;  %vm43_vm8 = vcmask 7168   ;;  %v424_v45 = vmov -inf   ;;  %v182_v47 = vlaneseq }
  0x26   :  { %v53_v2 = vld [vmem:[#allocation7 + $0x8] sm:$0xff]  ;;  %v76_v3 = vmul.f32 %v52_v0, %v52_v0  ;;  %v54_v4 = vmul.f32 %v50_v1, %v50_v1  ;;  %v51_v5 = vld [vmem:[#allocation5 + $0x8] sm:$0xff]  ;;  %45 = vst.msk [vmem:[#allocation2 + $0x8] sm:$0xff] %vm43_vm8, %v424_v45  ;;  %44 = vst.msk [vmem:[#allocation2] sm:$0xff] %vm43_vm8, %v424_v45  ;;  %v425_v46 = vmov 0.0   ;;  %vm233_vm12 = vcmask 130048  }
  0x27   :  { %v77_v6 = vmul.f32 %v53_v2, %v53_v2  ;;  %v55_v7 = vmul.f32 %v51_v5, %v51_v5  ;;  %46 = vst.msk [vmem:[#allocation3] sm:$0xff] %vm43_vm8, %v425_v46  ;;  %47 = vst.msk [vmem:[#allocation3 + $0x8] sm:$0xff] %vm43_vm8, %v425_v46  ;;  %v183_v48 = vshrl.u32 %v182_v47, 7  ;;  %v190_v51 = vand.u32 127, %v182_v47 }
  0x28   :  { %78 = vadd.xlane.f32.xlu0 %v76_v3  ;;  %56 = vadd.xlane.f32.xlu1 %v54_v4  ;;  %48 = vst.msk [vmem:[#allocation4] sm:$0xff] %vm43_vm8, %v425_v46  ;;  %49 = vst.msk [vmem:[#allocation4 + $0x8] sm:$0xff] %vm43_vm8, %v425_v46  ;;  %v426_v4 = vmov 0  }
  0x29   :  { %v184_v49 = vadd.s32 8, %v183_v48  ;;  %vm221_vm13 = vcmp.eq.s32.totalorder %v183_v48, %v190_v51  ;;  %343 = vset.pattern.permute.xlu1 %v426_v4  ;;  %342 = vset.pattern.permute.xlu0 %v426_v4 }
  0x2b   :  { %v194_v50 = vadd.s32 8, %v184_v49  ;;  %v199_v53 = vand.u32 15, %v184_v49  ;;  %vm222_vm11 = vcmp.eq.s32.totalorder %v184_v49, %v190_v51 }
  0x2c   :  { %80 = vadd.xlane.f32.xlu0 %v77_v6  ;;  %58 = vadd.xlane.f32.xlu1 %v55_v7 }
  0x2d   :  { %v206_v52 = vand.u32 15, %v194_v50  ;;  %vm476_vm10 = vcmp.eq.s32.totalorder %v190_v51, %v199_v53  ;;  %v247_v6 = vld [vmem:[#allocation2] sm:$0xff] }
  0x2e   :  { %v223_v57 = vsel %vm476_vm10, 0.1, %v425_v46 }
  0x2f   :  { %vm472_vm9 = vcmp.eq.s32.totalorder %v190_v51, %v206_v52 }
  0x30   :  { %v224_v56 = vsel %vm472_vm9, 0.1, %v425_v46 }
  0xb5   :  { %v79_v8 = vpop.xlane.xlu0 %78  ;;  %v57_v9 = vpop.xlane.xlu1 %56 }
  0xb6   :  { %344 = vrsqrt.f32 %v79_v8  ;;  %vm84_vm0 = vcmp.eq.f32.partialorder %v79_v8, inf  ;;  %v87_v15 = vand.u32 2147483648, %v79_v8  ;;  %vm86_vm1 = vcmp.eq.f32.partialorder %v79_v8, 0.0 }
  0xb7   :  { %346 = vrsqrt.f32 %v57_v9  ;;  %vm62_vm2 = vcmp.eq.f32.partialorder %v57_v9, inf  ;;  %v65_v18 = vand.u32 2147483648, %v57_v9  ;;  %vm64_vm3 = vcmp.eq.f32.partialorder %v57_v9, 0.0 }
  0xb9   :  { %v81_v10 = vpop.xlane.xlu0 %80  ;;  %v59_v11 = vpop.xlane.xlu1 %58 }
  0xba   :  { %348 = vrsqrt.f32 %v81_v10  ;;  %vm91_vm4 = vcmp.eq.f32.partialorder %v81_v10, inf  ;;  %v94_v26 = vand.u32 2147483648, %v81_v10  ;;  %vm93_vm5 = vcmp.eq.f32.partialorder %v81_v10, 0.0 }
  0xbb   :  { %350 = vrsqrt.f32 %v59_v11  ;;  %vm69_vm6 = vcmp.eq.f32.partialorder %v59_v11, inf  ;;  %v72_v33 = vand.u32 2147483648, %v59_v11  ;;  %vm71_vm7 = vcmp.eq.f32.partialorder %v59_v11, 0.0 }
  0xc0   :  { %v345_v12 = vpop.eup %344 }
  0xc1   :  { %v347_v13 = vpop.eup %346  ;;  %v83_v14 = vmul.f32 %v345_v12, %v79_v8 }
  0xc2   :  { %v61_v16 = vmul.f32 %v347_v13, %v57_v9 }
  0xc3   :  { %v85_v17 = vsel %vm84_vm0, %v79_v8, %v83_v14 }
  0xc4   :  { %v349_v19 = vpop.eup %348  ;;  %v88_v20 = vsel %vm86_vm1, %v87_v15, %v85_v17  ;;  %v63_v21 = vsel %vm62_vm2, %v57_v9, %v61_v16 }
  0xc5   :  { %v351_v22 = vpop.eup %350  ;;  %v96_v23 = vmax.f32 %v88_v20, 0.001  ;;  %v90_v24 = vmul.f32 %v349_v19, %v81_v10  ;;  %v66_v25 = vsel %vm64_vm3, %v65_v18, %v63_v21 }
  0xc6   :  { %v68_v27 = vmul.f32 %v351_v22, %v59_v11  ;;  %v74_v28 = vmax.f32 %v66_v25, 0.001 }
  0xc7   :  { %v92_v29 = vsel %vm91_vm4, %v81_v10, %v90_v24 }
  0xc8   :  { %v95_v30 = vsel %vm93_vm5, %v94_v26, %v92_v29  ;;  %352 = vrcp.f32 %v74_v28  ;;  %v70_v32 = vsel %vm69_vm6, %v59_v11, %v68_v27 }
  0xc9   :  { %v97_v31 = vmax.f32 %v95_v30, 0.001  ;;  %354 = vrcp.f32 %v96_v23  ;;  %v73_v34 = vsel %vm71_vm7, %v72_v33, %v70_v32  ;;  %v258_v30 = vld [vmem:[#allocation3 + $0x8] sm:$0xff]  ;;  %v257_v32 = vld [vmem:[#allocation3] sm:$0xff] }
  0xca   :  { %v75_v35 = vmax.f32 %v73_v34, 0.001 }
  0xcb   :  { %356 = vrcp.f32 %v97_v31 }
  0xcc   :  { %358 = vrcp.f32 %v75_v35 }
  0xd2   :  { %v353_v36 = vpop.eup %352 }
  0xd3   :  { %v355_v37 = vpop.eup %354  ;;  %v99_v38 = vmul.f32 %v353_v36, %v50_v1 }
  0xd4   :  { %v103_v40 = vmul.f32 %v355_v37, %v52_v0 }
  0xd5   :  { %v357_v39 = vpop.eup %356  ;;  %328 = vmatprep.mubr.f32.mxu0 %v99_v38 }
  0xd6   :  { %v105_v41 = vmul.f32 %v357_v39, %v53_v2  ;;  %v359_v43 = vpop.eup %358  ;;  %v229_v39 = vld [vmem:[#allocation4] sm:$0xff] }
  0xd7   :  { %v101_v44 = vmul.f32 %v359_v43, %v51_v5  ;;  %v248_v5 = vld [vmem:[#allocation2 + $0x8] sm:$0xff] }
  0xd8   :  { %v331_v42 = vpack.c.bf16 %v105_v41, %v103_v40 }
  0xda   :  { %332 = vmatprep.subr.bf16.mxu0 %v331_v42 }
  0xdb   :  { %334 = vmatpush3.bf16.xpose.msra.mxu0 %v331_v42  ;;  %v230_v42 = vld [vmem:[#allocation4 + $0x8] sm:$0xff] }
  0xe2   :  { %329 = vmatmul.mubr.f32.vlgmr.msra.gmra.mrb[0].mxu0 %v101_v44 }
 0x1b5   :  { %v330_v58 = vpop.f32.mrb[0].mxu0 }
 0x1b6   :  { %v226_v59 = vsub.f32 %v330_v58, %v224_v56  ;;  %v172_v60 = vpop.f32.mrb[1].mxu0 }
 0x1b7   :  { %v225_v61 = vsub.f32 %v172_v60, %v223_v57 }
 0x1b8   :  { %v228_v62 = vmul.f32 2.0, %v226_v59 }
 0x1b9   :  { %v227_v63 = vmul.f32 2.0, %v225_v61 }
 0x1ba   :  { %v246_v0 = vsel %vm222_vm11, -1e+09, %v228_v62  ;;  %v232_v25 = vsel %vm472_vm9, %v228_v62, 0.0 }
 0x1bb   :  { %v252_v1 = vsel %vm233_vm12, %v246_v0, -inf  ;;  %v245_v2 = vsel %vm221_vm13, -1e+09, %v227_v63  ;;  %v231_v23 = vsel %vm476_vm10, %v227_v63, 0.0  ;;  %v237_v26 = vsel %vm233_vm12, %v232_v25, 0.0 }
 0x1bc   :  { %253 = vmax.xlane.f32.xlu1 %v252_v1  ;;  %v249_v3 = vsel %vm233_vm12, %v245_v2, -inf  ;;  %v234_v24 = vsel %vm233_vm12, %v231_v23, 0.0 }
 0x1bd   :  { %250 = vmax.xlane.f32.xlu0 %v249_v3 }
 0x249   :  { %v254_v7 = vpop.xlane.xlu1 %253 }
 0x24a   :  { %v256_v8 = vmax.f32 %v248_v5, %v254_v7  ;;  %v251_v9 = vpop.xlane.xlu0 %250 }
 0x24b   :  { %v255_v10 = vmax.f32 %v247_v6, %v251_v9 }
 0x24c   :  { %v260_v11 = vsub.f32 %v248_v5, %v256_v8  ;;  %294 = vst.msk [vmem:[#allocation2 + $0x8] sm:$0xff] %vm43_vm8, %v256_v8  ;;  %274 = vperm.xlu1 %343, %v256_v8  }
 0x24d   :  { %v259_v12 = vsub.f32 %v247_v6, %v255_v10  ;;  %293 = vst.msk [vmem:[#allocation2] sm:$0xff] %vm43_vm8, %v255_v10  ;;  %269 = vperm.xlu0 %342, %v255_v10  }
 0x24e   :  { %v263_v27 = vmul.f32 1.442695, %v260_v11 }
 0x24f   :  { %v261_v28 = vmul.f32 1.442695, %v259_v12 }
 0x253   :  { %v299_v50 = vld [vmem:[#allocation2 + $0x8] sm:$0xff] }
 0x254   :  { %v298_v52 = vld [vmem:[#allocation2] sm:$0xff] }
 0x2cb   :  { %v275_v13 = vpop.permute.xlu1 %274 }
 0x2cc   :  { %v278_v14 = vsub.f32 %v246_v0, %v275_v13  ;;  %v270_v15 = vpop.permute.xlu0 %269 }
 0x2cd   :  { %v277_v16 = vsub.f32 %v245_v2, %v270_v15 }
 0x2ce   :  { %v281_v17 = vmul.f32 1.442695, %v278_v14 }
 0x2cf   :  { %v279_v18 = vmul.f32 1.442695, %v277_v16 }
 0x2d0   :  { %360 = vpow2.f32 %v281_v17 }
 0x2d1   :  { %362 = vpow2.f32 %v279_v18 }
 0x2d2   :  { %364 = vpow2.f32 %v263_v27 }
 0x2d3   :  { %366 = vpow2.f32 %v261_v28 }
 0x2da   :  { %v361_v19 = vpop.eup %360 }
 0x2db   :  { %v363_v20 = vpop.eup %362  ;;  %v286_v21 = vsel %vm233_vm12, %v361_v19, 0.0 }
 0x2dc   :  { %287 = vadd.xlane.f32.xlu0 %v286_v21  ;;  %v283_v22 = vsel %vm233_vm12, %v363_v20, 0.0  ;;  %v365_v29 = vpop.eup %364 }
 0x2dd   :  { %284 = vadd.xlane.f32.xlu1 %v283_v22  ;;  %v367_v31 = vpop.eup %366  ;;  %v266_v33 = vmul.f32 %v365_v29, %v258_v30 }
 0x2de   :  { %v265_v35 = vmul.f32 %v367_v31, %v257_v32 }
 0x2e1   :  { %235 = vadd.xlane.f32.xlu1 %v234_v24 }
 0x2e5   :  { %238 = vadd.xlane.f32.xlu1 %v237_v26 }
 0x369   :  { %v288_v34 = vpop.xlane.xlu0 %287 }
 0x36a   :  { %v290_v36 = vadd.f32 %v288_v34, %v266_v33  ;;  %v285_v37 = vpop.xlane.xlu1 %284 }
 0x36b   :  { %v289_v38 = vadd.f32 %v285_v37, %v265_v35 }
 0x36c   :  { %292 = vst.msk [vmem:[#allocation3 + $0x8] sm:$0xff] %vm43_vm8, %v290_v36 }
 0x36d   :  { %291 = vst.msk [vmem:[#allocation3] sm:$0xff] %vm43_vm8, %v289_v38 }
 0x36e   :  { %v236_v40 = vpop.xlane.xlu1 %235 }
 0x36f   :  { %v240_v41 = vadd.f32 %v236_v40, %v229_v39 }
 0x371   :  { %243 = vst.msk [vmem:[#allocation4] sm:$0xff] %vm43_vm8, %v240_v41 }
 0x372   :  { %v239_v43 = vpop.xlane.xlu1 %238 }
 0x373   :  { %v301_v44 = vld [vmem:[#allocation3 + $0x8] sm:$0xff]  ;;  %v241_v45 = vadd.f32 %v239_v43, %v230_v42 }
 0x374   :  { %368 = vlog2.f32 %v301_v44  ;;  %v300_v46 = vld [vmem:[#allocation3] sm:$0xff] }
 0x375   :  { %370 = vlog2.f32 %v300_v46  ;;  %244 = vst.msk [vmem:[#allocation4 + $0x8] sm:$0xff] %vm43_vm8, %v241_v45 }
 0x378   :  { %v308_v56 = vld [vmem:[#allocation4] sm:$0xff] }
 0x37c   :  { %v309_v55 = vld [vmem:[#allocation4 + $0x8] sm:$0xff] }
 0x37e   :  { %v369_v47 = vpop.eup %368 }
 0x37f   :  { %v371_v48 = vpop.eup %370  ;;  %v305_v49 = vmul.f32 0.6931472, %v369_v47 }
 0x380   :  { %v303_v51 = vmul.f32 0.6931472, %v371_v48 }
 0x381   :  { %v307_v53 = vadd.f32 %v305_v49, %v299_v50 }
 0x382   :  { %v306_v54 = vadd.f32 %v303_v51, %v298_v52 }
 0x383   :  { %v311_v57 = vsub.f32 %v307_v53, %v309_v55 }
 0x384   :  { %v310_v58 = vsub.f32 %v306_v54, %v308_v56 }
 0x385   :  { %313 = vst.msk [vmem:[%s510_s2 + $0x8] sm:$0xff] %vm43_vm8, %v311_v57 }
 0x386   :  { %312 = vst.msk [vmem:[%s510_s2] sm:$0xff] %vm43_vm8, %v310_v58 }
 0x387   :  { %318 = vsyncpa [#allocation6], 1 }
 0x388   :  { %319 = vsyncpa [#allocation8], 1 }

</bundles_post_ra>
